<compile_context>
chip_gen: v7x
topology: tpu7x:2x2x1
jax: 0.10.0
libtpu: 0.0.40
codegen_flags: <defaults>
</compile_context>

<pallas_src>
import jax
import jax.numpy as jnp
from jax.experimental import pallas as pl
from jax.experimental.pallas import tpu as pltpu


# ------------------------------ fused kernel ------------------------------- #

def _make_fused_cnn_kernel(batch, n_conv):
    """Builds the fused kernel body.  `batch` and `n_conv` are static; the whole
    forward (all conv layers + FC) runs in a single grid step with the batch
    folded into the matmul lane dimension."""

    def kernel(*refs):
        f32 = jnp.float32
        x_ref = refs[0]                              # (Cp0, L0*B)  l-major columns
        conv_refs = refs[1:1 + 2 * n_conv]           # (w_cat, bias) pairs
        wfc_ref = refs[1 + 2 * n_conv]               # (O, C_last*L_last)  l-major cols
        bfc_ref = refs[2 + 2 * n_conv]               # (O, 1)
        o_ref = refs[3 + 2 * n_conv]                 # (O, B)

        B = batch
        h = x_ref[...]                               # (Cp, L*B)
        L = h.shape[1] // B

        for i in range(n_conv):
            w = conv_refs[2 * i][...]                # (C_out, 3*Cp)
            b = conv_refs[2 * i + 1][...]            # (C_out, 1)
            cp = w.shape[1] // 3
            if h.shape[0] < cp:                      # pad channel rows to packed Cp
                h = jnp.concatenate(
                    [h, jnp.zeros((cp - h.shape[0], h.shape[1]), f32)], axis=0)

            # "same"-padding shifts: one position == B lanes in l-major order.
            # Zero block at the segment edge == the conv's zero padding.
            z = jnp.zeros((cp, B), f32)
            if L > 1:
                prev = jnp.concatenate([z, h[:, :-B]], axis=1)   # h[l-1]
                nxt = jnp.concatenate([h[:, B:], z], axis=1)     # h[l+1]
            else:
                prev, nxt = z, z
            cols = jnp.concatenate([prev, h, nxt], axis=0)       # im2col (3*Cp, L*B)

            # Conv1d + bias + ReLU: ONE matmul for the whole batch.
            y = jnp.dot(w, cols, preferred_element_type=f32) + b
            y = jnp.maximum(y, 0.0)

            # MaxPool1d(2, 2): max of adjacent position blocks (unit-stride slices).
            L_out = L // 2
            pooled = [jnp.maximum(y[:, (2 * j) * B:(2 * j + 1) * B],
                                  y[:, (2 * j + 1) * B:(2 * j + 2) * B])
                      for j in range(L_out)]
            h = pooled[0] if L_out == 1 else jnp.concatenate(pooled, axis=1)
            L = L_out

        # FC head: stack the per-position (C_last, B) blocks along the contraction
        # axis (row order = l*C_last + c, matching the pack-time weight re-order)
        # and do ONE matmul for the whole batch.
        blocks = [h[:, l * B:(l + 1) * B] for l in range(L)]
        cols_fc = blocks[0] if L == 1 else jnp.concatenate(blocks, axis=0)
        out_t = jnp.dot(wfc_ref[...], cols_fc,
                        preferred_element_type=f32) + bfc_ref[...]   # (O, B)
        o_ref[...] = out_t                           # single whole-block store

    return kernel


# ------------------------------- wrappers ----------------------------------- #

def cnn_forward(packed_params, x_ncl):
    """Fused forward: x_ncl (B, C, L) PyTorch NCL layout -> (B, output_size)."""
    B, C, L = x_ncl.shape
    convs = packed_params["convs"]
    w_fc, b_fc = packed_params["fc"]                 # (O, C_last*L_last), (O, 1)
    out_features = w_fc.shape[0]
    n_conv = len(convs)
    cp0 = convs[0][0].shape[1] // 3

    # Layout plumbing (trace-time glue, not per-element compute):
    #   (B, C, L) -> (Cp0, L*B) with column index = l*B + b and channel rows
    #   zero-padded to the f32 sublane tile (8).
    h0 = jnp.transpose(x_ncl, (1, 2, 0)).reshape(C, L * B)
    h0 = jnp.pad(h0, ((0, cp0 - C), (0, 0)))

    inputs = [h0]
    in_specs = [pl.BlockSpec(h0.shape, lambda i: (0, 0))]
    for w, b in convs:
        inputs += [w, b]
        in_specs += [pl.BlockSpec(w.shape, lambda i: (0, 0)),
                     pl.BlockSpec(b.shape, lambda i: (0, 0))]
    inputs += [w_fc, b_fc]
    in_specs += [pl.BlockSpec(w_fc.shape, lambda i: (0, 0)),
                 pl.BlockSpec(b_fc.shape, lambda i: (0, 0))]

    out_t = pl.pallas_call(
        _make_fused_cnn_kernel(B, n_conv),
        out_shape=jax.ShapeDtypeStruct((out_features, B), jnp.float32),
        grid_spec=pltpu.PrefetchScalarGridSpec(
            num_scalar_prefetch=0,
            grid=(1,),                      # whole forward = one grid step
            in_specs=in_specs,
            out_specs=pl.BlockSpec((out_features, B), lambda i: (0, 0)),
        ),
        compiler_params=pltpu.CompilerParams(
            dimension_semantics=("arbitrary",)),
    )(*inputs)
    return out_t.T                                   # (B, O)


# ------------------------- parameters / packing ----------------------------- #

def init_cnn_params(key, input_size, seq_len, output_size, cnn_hidden_list):
    """PyTorch-layout params: kaiming_normal_ weights, zero biases
    (matching CNN.init_weights())."""
    params = {"convs": []}
    chans = [input_size] + list(cnn_hidden_list)
    L = seq_len
    for ci, co in zip(chans[:-1], chans[1:]):
        key, kw = jax.random.split(key)
        fan_in = ci * 3
        w = jax.random.normal(kw, (co, ci, 3), jnp.float32) * jnp.sqrt(2.0 / fan_in)
        params["convs"].append((w, jnp.zeros((co,), jnp.float32)))
        L = (L + 2 - 3) // 1 + 1      # conv k=3, s=1, p=1 keeps length
        L = (L - 2) // 2 + 1          # maxpool(2, 2)
    fc_in = chans[-1] * L
    key, kw = jax.random.split(key)
    w_fc = jax.random.normal(kw, (output_size, fc_in), jnp.float32) \
        * jnp.sqrt(2.0 / fc_in)
    params["fc"] = (w_fc, jnp.zeros((output_size,), jnp.float32))
    return params


def pack_cnn_params(params):
    """Repack PyTorch-layout params into the layout the fused kernel consumes.
    Runs once at trace time (plain JAX); nothing here happens per forward.
      conv weight: (C_out, 3*Cp) im2col layout, column index = k*Cp + c
                   (k=0 -> l-1, k=1 -> l, k=2 -> l+1), Cp = C_in rounded to 8
      conv bias:   (C_out, 1)
      fc weight:   (O, C_last*L_last) with column index = l*C_last + c, matching
                   the kernel's l-major contraction-axis stacking
      fc bias:     (O, 1)
    """
    packed = {"convs": []}
    for w, b in params["convs"]:                       # (C_out, C_in, 3), (C_out,)
        co, ci, k = w.shape
        ci_pad = ((ci + 7) // 8) * 8
        w_kc = jnp.transpose(w, (0, 2, 1))             # (C_out, 3, C_in)
        w_kc = jnp.pad(w_kc, ((0, 0), (0, 0), (0, ci_pad - ci)))
        packed["convs"].append((w_kc.reshape(co, k * ci_pad),
                                b.reshape(co, 1)))
    w_fc, b_fc = params["fc"]                          # (O, C_last*L_last), (O,)
    out_features, fc_in = w_fc.shape
    c_last = params["convs"][-1][0].shape[0]
    l_last = fc_in // c_last
    w3 = w_fc.reshape(out_features, c_last, l_last)    # [o, c, l]
    w_pk = jnp.transpose(w3, (0, 2, 1)).reshape(out_features, l_last * c_last)
    packed["fc"] = (w_pk, b_fc.reshape(out_features, 1))
    return packed


# ---------------------------- pure-JAX reference ---------------------------- #

def cnn_forward_reference(params, x_ncl):
    """Direct (non-Pallas) implementation of the PyTorch module, for checking."""
    hi = jax.lax.Precision.HIGHEST
    h = x_ncl
    for w, b in params["convs"]:                       # (C_out, C_in, 3), (C_out,)
        y = jax.lax.conv_general_dilated(
            h, w, window_strides=(1,), padding=((1, 1),),
            dimension_numbers=("NCH", "OIH", "NCH"), precision=hi)
        y = jnp.maximum(y + b[None, :, None], 0.0)
        L = y.shape[2]
        h = jnp.maximum(y[:, :, 0:2 * (L // 2):2], y[:, :, 1:2 * (L // 2) + 1:2])
    w_fc, b_fc = params["fc"]
    flat = h.reshape(h.shape[0], -1)                   # PyTorch channel-major flatten
    return jnp.dot(flat, w_fc.T, precision=hi) + b_fc[None, :]


# ----------------------------------- main ------------------------------------ #

if __name__ == "__main__":
    # Small shapes consistent with the module:
    #   input_size=4, seq_len=16, cnn_hidden_list=[8, 16], output_size=1
    B, C, L = 2, 4, 16
    cnn_hidden = [8, 16]
    output_size = 1

    key = jax.random.PRNGKey(0)
    kx, kp = jax.random.split(key)
    x = jax.random.normal(kx, (B, C, L), jnp.float32)      # PyTorch NCL input
    params = init_cnn_params(kp, C, L, output_size, cnn_hidden)
    packed = pack_cnn_params(params)

    out = jax.block_until_ready(cnn_forward(packed, x))
    assert out.shape == (B, output_size) and out.dtype == jnp.float32

    ref = jax.block_until_ready(cnn_forward_reference(params, x))
    assert bool(jnp.allclose(out, ref, rtol=2e-3, atol=2e-3)), (out, ref)

    print("KERNEL_OK")
</pallas_src>

<mosaic_0001>
module attributes {stable_mosaic.version = 11 : i64} {
  func.func @kernel(%arg0: i32, %arg1: memref<8x32xf32, #tpu.memory_space<vmem>>, %arg2: memref<8x24xf32, #tpu.memory_space<vmem>>, %arg3: memref<8x1xf32, #tpu.memory_space<vmem>>, %arg4: memref<16x24xf32, #tpu.memory_space<vmem>>, %arg5: memref<16x1xf32, #tpu.memory_space<vmem>>, %arg6: memref<1x64xf32, #tpu.memory_space<vmem>>, %arg7: memref<1x1xf32, #tpu.memory_space<vmem>>, %arg8: memref<1x2xf32, #tpu.memory_space<vmem>>) attributes {dimension_semantics = [#tpu.dimension_semantics<arbitrary>], iteration_bounds = array<i64: 1>, scalar_prefetch = 0 : i64, scratch_operands = 0 : i64, tpu.core_type = #tpu.core_type<tc>, window_params = [{pipeline_mode = #tpu.pipeline_mode<synchronous>, transform_indices = @transform_0, window_bounds = array<i64: 8, 32>}, {pipeline_mode = #tpu.pipeline_mode<synchronous>, transform_indices = @transform_1, window_bounds = array<i64: 8, 24>}, {pipeline_mode = #tpu.pipeline_mode<synchronous>, transform_indices = @transform_2, window_bounds = array<i64: 8, 1>}, {pipeline_mode = #tpu.pipeline_mode<synchronous>, transform_indices = @transform_3, window_bounds = array<i64: 16, 24>}, {pipeline_mode = #tpu.pipeline_mode<synchronous>, transform_indices = @transform_4, window_bounds = array<i64: 16, 1>}, {pipeline_mode = #tpu.pipeline_mode<synchronous>, transform_indices = @transform_5, window_bounds = array<i64: 1, 64>}, {pipeline_mode = #tpu.pipeline_mode<synchronous>, transform_indices = @transform_6, window_bounds = array<i64: 1, 1>}, {pipeline_mode = #tpu.pipeline_mode<synchronous>, transform_indices = @transform_7, window_bounds = array<i64: 1, 2>}]} {
    %c0 = arith.constant 0 : index
    %c0_0 = arith.constant 0 : index
    %0 = vector.load %arg1[%c0, %c0_0] : memref<8x32xf32, #tpu.memory_space<vmem>>, vector<8x32xf32>
    %c0_1 = arith.constant 0 : index
    %c0_2 = arith.constant 0 : index
    %1 = vector.load %arg2[%c0_1, %c0_2] : memref<8x24xf32, #tpu.memory_space<vmem>>, vector<8x24xf32>
    %c0_3 = arith.constant 0 : index
    %c0_4 = arith.constant 0 : index
    %2 = vector.load %arg3[%c0_3, %c0_4] : memref<8x1xf32, #tpu.memory_space<vmem>>, vector<8x1xf32>
    %cst = arith.constant 0.000000e+00 : f32
    %3 = vector.broadcast %cst : f32 to vector<8x2xf32>
    %4 = vector.extract_strided_slice %0 {offsets = [0, 0], sizes = [8, 30], strides = [1, 1]} : vector<8x32xf32> to vector<8x30xf32>
    %5 = tpu.concatenate %3, %4 in 1 : vector<8x2xf32>, vector<8x30xf32> -> vector<8x32xf32>
    %6 = vector.extract_strided_slice %0 {offsets = [0, 2], sizes = [8, 30], strides = [1, 1]} : vector<8x32xf32> to vector<8x30xf32>
    %7 = tpu.concatenate %6, %3 in 1 : vector<8x30xf32>, vector<8x2xf32> -> vector<8x32xf32>
    %8 = tpu.concatenate %5, %0, %7 in 0 : vector<8x32xf32>, vector<8x32xf32>, vector<8x32xf32> -> vector<24x32xf32>
    %cst_5 = arith.constant dense<0.000000e+00> : vector<8x32xf32>
    %9 = tpu.matmul %1, %8, %cst_5 {dimension_numbers = #tpu.dot_dimension_numbers<[1], [0], [0], [1], [0, 0, 1, 1], [], []>} : vector<8x24xf32>, vector<24x32xf32>, vector<8x32xf32> -> vector<8x32xf32>
    %10 = vector.broadcast %2 : vector<8x1xf32> to vector<8x32xf32>
    %11 = arith.addf %9, %10 : vector<8x32xf32>
    %cst_6 = arith.constant 0.000000e+00 : f32
    %12 = vector.broadcast %cst_6 : f32 to vector<8x32xf32>
    %13 = arith.maximumf %11, %12 : vector<8x32xf32>
    %14 = vector.extract_strided_slice %13 {offsets = [0, 0], sizes = [8, 2], strides = [1, 1]} : vector<8x32xf32> to vector<8x2xf32>
    %15 = vector.extract_strided_slice %13 {offsets = [0, 2], sizes = [8, 2], strides = [1, 1]} : vector<8x32xf32> to vector<8x2xf32>
    %16 = arith.maximumf %14, %15 : vector<8x2xf32>
    %17 = vector.extract_strided_slice %13 {offsets = [0, 4], sizes = [8, 2], strides = [1, 1]} : vector<8x32xf32> to vector<8x2xf32>
    %18 = vector.extract_strided_slice %13 {offsets = [0, 6], sizes = [8, 2], strides = [1, 1]} : vector<8x32xf32> to vector<8x2xf32>
    %19 = arith.maximumf %17, %18 : vector<8x2xf32>
    %20 = vector.extract_strided_slice %13 {offsets = [0, 8], sizes = [8, 2], strides = [1, 1]} : vector<8x32xf32> to vector<8x2xf32>
    %21 = vector.extract_strided_slice %13 {offsets = [0, 10], sizes = [8, 2], strides = [1, 1]} : vector<8x32xf32> to vector<8x2xf32>
    %22 = arith.maximumf %20, %21 : vector<8x2xf32>
    %23 = vector.extract_strided_slice %13 {offsets = [0, 12], sizes = [8, 2], strides = [1, 1]} : vector<8x32xf32> to vector<8x2xf32>
    %24 = vector.extract_strided_slice %13 {offsets = [0, 14], sizes = [8, 2], strides = [1, 1]} : vector<8x32xf32> to vector<8x2xf32>
    %25 = arith.maximumf %23, %24 : vector<8x2xf32>
    %26 = vector.extract_strided_slice %13 {offsets = [0, 16], sizes = [8, 2], strides = [1, 1]} : vector<8x32xf32> to vector<8x2xf32>
    %27 = vector.extract_strided_slice %13 {offsets = [0, 18], sizes = [8, 2], strides = [1, 1]} : vector<8x32xf32> to vector<8x2xf32>
    %28 = arith.maximumf %26, %27 : vector<8x2xf32>
    %29 = vector.extract_strided_slice %13 {offsets = [0, 20], sizes = [8, 2], strides = [1, 1]} : vector<8x32xf32> to vector<8x2xf32>
    %30 = vector.extract_strided_slice %13 {offsets = [0, 22], sizes = [8, 2], strides = [1, 1]} : vector<8x32xf32> to vector<8x2xf32>
    %31 = arith.maximumf %29, %30 : vector<8x2xf32>
    %32 = vector.extract_strided_slice %13 {offsets = [0, 24], sizes = [8, 2], strides = [1, 1]} : vector<8x32xf32> to vector<8x2xf32>
    %33 = vector.extract_strided_slice %13 {offsets = [0, 26], sizes = [8, 2], strides = [1, 1]} : vector<8x32xf32> to vector<8x2xf32>
    %34 = arith.maximumf %32, %33 : vector<8x2xf32>
    %35 = vector.extract_strided_slice %13 {offsets = [0, 28], sizes = [8, 2], strides = [1, 1]} : vector<8x32xf32> to vector<8x2xf32>
    %36 = vector.extract_strided_slice %13 {offsets = [0, 30], sizes = [8, 2], strides = [1, 1]} : vector<8x32xf32> to vector<8x2xf32>
    %37 = arith.maximumf %35, %36 : vector<8x2xf32>
    %38 = tpu.concatenate %16, %19, %22, %25, %28, %31, %34, %37 in 1 : vector<8x2xf32>, vector<8x2xf32>, vector<8x2xf32>, vector<8x2xf32>, vector<8x2xf32>, vector<8x2xf32>, vector<8x2xf32>, vector<8x2xf32> -> vector<8x16xf32>
    %c0_7 = arith.constant 0 : index
    %c0_8 = arith.constant 0 : index
    %39 = vector.load %arg4[%c0_7, %c0_8] : memref<16x24xf32, #tpu.memory_space<vmem>>, vector<16x24xf32>
    %c0_9 = arith.constant 0 : index
    %c0_10 = arith.constant 0 : index
    %40 = vector.load %arg5[%c0_9, %c0_10] : memref<16x1xf32, #tpu.memory_space<vmem>>, vector<16x1xf32>
    %cst_11 = arith.constant 0.000000e+00 : f32
    %41 = vector.broadcast %cst_11 : f32 to vector<8x2xf32>
    %42 = vector.extract_strided_slice %38 {offsets = [0, 0], sizes = [8, 14], strides = [1, 1]} : vector<8x16xf32> to vector<8x14xf32>
    %43 = tpu.concatenate %41, %42 in 1 : vector<8x2xf32>, vector<8x14xf32> -> vector<8x16xf32>
    %44 = vector.extract_strided_slice %38 {offsets = [0, 2], sizes = [8, 14], strides = [1, 1]} : vector<8x16xf32> to vector<8x14xf32>
    %45 = tpu.concatenate %44, %41 in 1 : vector<8x14xf32>, vector<8x2xf32> -> vector<8x16xf32>
    %46 = tpu.concatenate %43, %38, %45 in 0 : vector<8x16xf32>, vector<8x16xf32>, vector<8x16xf32> -> vector<24x16xf32>
    %cst_12 = arith.constant dense<0.000000e+00> : vector<16x16xf32>
    %47 = tpu.matmul %39, %46, %cst_12 {dimension_numbers = #tpu.dot_dimension_numbers<[1], [0], [0], [1], [0, 0, 1, 1], [], []>} : vector<16x24xf32>, vector<24x16xf32>, vector<16x16xf32> -> vector<16x16xf32>
    %48 = vector.broadcast %40 : vector<16x1xf32> to vector<16x16xf32>
    %49 = arith.addf %47, %48 : vector<16x16xf32>
    %cst_13 = arith.constant 0.000000e+00 : f32
    %50 = vector.broadcast %cst_13 : f32 to vector<16x16xf32>
    %51 = arith.maximumf %49, %50 : vector<16x16xf32>
    %52 = vector.extract_strided_slice %51 {offsets = [0, 0], sizes = [16, 2], strides = [1, 1]} : vector<16x16xf32> to vector<16x2xf32>
    %53 = vector.extract_strided_slice %51 {offsets = [0, 2], sizes = [16, 2], strides = [1, 1]} : vector<16x16xf32> to vector<16x2xf32>
    %54 = arith.maximumf %52, %53 : vector<16x2xf32>
    %55 = vector.extract_strided_slice %51 {offsets = [0, 4], sizes = [16, 2], strides = [1, 1]} : vector<16x16xf32> to vector<16x2xf32>
    %56 = vector.extract_strided_slice %51 {offsets = [0, 6], sizes = [16, 2], strides = [1, 1]} : vector<16x16xf32> to vector<16x2xf32>
    %57 = arith.maximumf %55, %56 : vector<16x2xf32>
    %58 = vector.extract_strided_slice %51 {offsets = [0, 8], sizes = [16, 2], strides = [1, 1]} : vector<16x16xf32> to vector<16x2xf32>
    %59 = vector.extract_strided_slice %51 {offsets = [0, 10], sizes = [16, 2], strides = [1, 1]} : vector<16x16xf32> to vector<16x2xf32>
    %60 = arith.maximumf %58, %59 : vector<16x2xf32>
    %61 = vector.extract_strided_slice %51 {offsets = [0, 12], sizes = [16, 2], strides = [1, 1]} : vector<16x16xf32> to vector<16x2xf32>
    %62 = vector.extract_strided_slice %51 {offsets = [0, 14], sizes = [16, 2], strides = [1, 1]} : vector<16x16xf32> to vector<16x2xf32>
    %63 = arith.maximumf %61, %62 : vector<16x2xf32>
    %64 = tpu.concatenate %54, %57, %60, %63 in 1 : vector<16x2xf32>, vector<16x2xf32>, vector<16x2xf32>, vector<16x2xf32> -> vector<16x8xf32>
    %65 = vector.extract_strided_slice %64 {offsets = [0, 0], sizes = [16, 2], strides = [1, 1]} : vector<16x8xf32> to vector<16x2xf32>
    %66 = vector.extract_strided_slice %64 {offsets = [0, 2], sizes = [16, 2], strides = [1, 1]} : vector<16x8xf32> to vector<16x2xf32>
    %67 = vector.extract_strided_slice %64 {offsets = [0, 4], sizes = [16, 2], strides = [1, 1]} : vector<16x8xf32> to vector<16x2xf32>
    %68 = vector.extract_strided_slice %64 {offsets = [0, 6], sizes = [16, 2], strides = [1, 1]} : vector<16x8xf32> to vector<16x2xf32>
    %69 = tpu.concatenate %65, %66, %67, %68 in 0 : vector<16x2xf32>, vector<16x2xf32>, vector<16x2xf32>, vector<16x2xf32> -> vector<64x2xf32>
    %c0_14 = arith.constant 0 : index
    %c0_15 = arith.constant 0 : index
    %70 = vector.load %arg6[%c0_14, %c0_15] : memref<1x64xf32, #tpu.memory_space<vmem>>, vector<1x64xf32>
    %cst_16 = arith.constant dense<0.000000e+00> : vector<1x2xf32>
    %71 = tpu.matmul %70, %69, %cst_16 {dimension_numbers = #tpu.dot_dimension_numbers<[1], [0], [0], [1], [0, 0, 1, 1], [], []>} : vector<1x64xf32>, vector<64x2xf32>, vector<1x2xf32> -> vector<1x2xf32>
    %c0_17 = arith.constant 0 : index
    %c0_18 = arith.constant 0 : index
    %72 = vector.load %arg7[%c0_17, %c0_18] : memref<1x1xf32, #tpu.memory_space<vmem>>, vector<1x1xf32>
    %73 = vector.broadcast %72 : vector<1x1xf32> to vector<1x2xf32>
    %74 = arith.addf %71, %73 : vector<1x2xf32>
    %c0_19 = arith.constant 0 : index
    %c0_20 = arith.constant 0 : index
    %75 = vector.load %arg8[%c0_19, %c0_20] : memref<1x2xf32, #tpu.memory_space<vmem>>, vector<1x2xf32>
    tpu.vector_store %arg8[%c0_19, %c0_20], %74 {strides = array<i32>} : memref<1x2xf32, #tpu.memory_space<vmem>>, vector<1x2xf32>,
    return
  }
  func.func @transform_0(%arg0: i32) -> (i32, i32) {
    %c0_i32 = arith.constant 0 : i32
    %c0_i32_0 = arith.constant 0 : i32
    %c0_i32_1 = arith.constant 0 : i32
    return %c0_i32, %c0_i32_0 : i32, i32
  }
  func.func @transform_1(%arg0: i32) -> (i32, i32) {
    %c0_i32 = arith.constant 0 : i32
    %c0_i32_0 = arith.constant 0 : i32
    %c0_i32_1 = arith.constant 0 : i32
    return %c0_i32, %c0_i32_0 : i32, i32
  }
  func.func @transform_2(%arg0: i32) -> (i32, i32) {
    %c0_i32 = arith.constant 0 : i32
    %c0_i32_0 = arith.constant 0 : i32
    %c0_i32_1 = arith.constant 0 : i32
    return %c0_i32, %c0_i32_0 : i32, i32
  }
  func.func @transform_3(%arg0: i32) -> (i32, i32) {
    %c0_i32 = arith.constant 0 : i32
    %c0_i32_0 = arith.constant 0 : i32
    %c0_i32_1 = arith.constant 0 : i32
    return %c0_i32, %c0_i32_0 : i32, i32
  }
  func.func @transform_4(%arg0: i32) -> (i32, i32) {
    %c0_i32 = arith.constant 0 : i32
    %c0_i32_0 = arith.constant 0 : i32
    %c0_i32_1 = arith.constant 0 : i32
    return %c0_i32, %c0_i32_0 : i32, i32
  }
  func.func @transform_5(%arg0: i32) -> (i32, i32) {
    %c0_i32 = arith.constant 0 : i32
    %c0_i32_0 = arith.constant 0 : i32
    %c0_i32_1 = arith.constant 0 : i32
    return %c0_i32, %c0_i32_0 : i32, i32
  }
  func.func @transform_6(%arg0: i32) -> (i32, i32) {
    %c0_i32 = arith.constant 0 : i32
    %c0_i32_0 = arith.constant 0 : i32
    %c0_i32_1 = arith.constant 0 : i32
    return %c0_i32, %c0_i32_0 : i32, i32
  }
  func.func @transform_7(%arg0: i32) -> (i32, i32) {
    %c0_i32 = arith.constant 0 : i32
    %c0_i32_0 = arith.constant 0 : i32
    %c0_i32_1 = arith.constant 0 : i32
    return %c0_i32, %c0_i32_0 : i32, i32
  }
}

</mosaic_0001>

<bundles_post_ra>
// kernel: tpu_custom_call.1
= control target key start
LH: loop header
LB: loop body
LE: loop exit
PB: predicated region body
PF: predicated region fallthrough
CT: control target
= control target key end

     0   :  { %s727_s0 = inlined_call_operand.vmem [shape: f32[8,32], index: 0, kind: input, shape index: {}]   ;;  %s728_s1 = inlined_call_operand.vmem [shape: f32[8,24], index: 1, kind: input, shape index: {}]   ;;  %s729_s2 = inlined_call_operand.vmem [shape: f32[8,1], index: 2, kind: input, shape index: {}]   ;;  %s730_s3 = inlined_call_operand.vmem [shape: f32[16,24], index: 3, kind: input, shape index: {}]   ;;  %s731_s4 = inlined_call_operand.vmem [shape: f32[16,1], index: 4, kind: input, shape index: {}]   ;;  %s732_s5 = inlined_call_operand.vmem [shape: f32[1,64], index: 5, kind: input, shape index: {}]   ;;  %s733_s6 = inlined_call_operand.<no memory space> [shape: f32[1,1], index: 6, kind: input, shape index: {}]   ;;  %s734_s7 = inlined_call_operand.hbm [shape: f32[1,2], index: 7, kind: output, shape index: {}]  }
   0x1   :  { %v12_v0 = vstv %s733_s6 }
   0x2   :  { %13 = vst [vmem:[#allocation2] sm:$0x1] %v12_v0 }
   0x3   :  { %v29_v1 = vld [vmem:[%s727_s0] sm:$0xff]  ;;  %s588_s28 = smov 2   ;;  %v589_v2 = vmov 0.0|0.0   ;;  %vm590_vm0 = vmmov 0   ;;  %v591_v4 = vmov 0.0   ;;  %v592_v5 = vmov 0  }
   0x4   :  { %33 = vrot.lane.b32.xlu0 %v29_v1, %s588_s28  ;;  %491 = vmatprep.subr.bf16.mxu1 %v589_v2  ;;  %v31_v3 = vld [vmem:[%s729_s2] sm:$0xff] }
   0x5   :  { %460 = vmatprep.mubr.msk.f32.mxu1 %vm590_vm0, %v591_v4  ;;  %501 = vmatprep.subr.bf16.mxu0 %v589_v2 }
   0x6   :  { %527 = vset.pattern.permute.xlu1 %v592_v5  ;;  %528 = vset.pattern.permute.xlu0 %v592_v5 }
   0x7   :  { %14 = vsyncpa [#allocation4], 0  ;;  %45 = vperm.xlu1 %527, %v31_v3   ;;  %488 = vmatprep.mubr.msk.f32.mxu0 %vm590_vm0, %v591_v4  ;;  %s593_s0 = smov 126   ;;  %vm36_vm1 = vcmask 15360   ;;  %vm594_vm3 = vmmov 1   ;;  %vm41_vm5 = vcmask 244736  }
   0x8   :  { %38 = vrot.lane.b32.xlu0 %v29_v1, %s593_s0  ;;  %vm426_vm2 = vmneg %vm36_vm1  ;;  %v30_v10 = vld [vmem:[%s728_s1] sm:$0xff]  ;;  %vm48_vm6 = vcmask 195584   ;;  %s595_s8 = smov 124   ;;  %s596_s9 = smov 120   ;;  %vm151_vm7 = vcmask 31744   ;;  %vm153_vm8 = vcmask 48128  }
   0x9   :  { %vm656_vm4 = vmpackc.low %vm594_vm3, %vm426_vm2  ;;  %s597_s1 = smov 122   ;;  %s598_s10 = smov 116   ;;  %vm155_vm9 = vcmask 64512   ;;  %vm157_vm10 = vcmask 80896   ;;  %v163_v25 = vld [vmem:[%s730_s3] sm:$0xff]  ;;  %vm159_vm11 = vcmask 97280  }
   0xa   :  { %s599_s11 = smov 118   ;;  %s600_s12 = smov 114   ;;  %vm161_vm12 = vcmask 113664   ;;  %v165_v33 = vld [vmem:[%s731_s4] sm:$0xff]  ;;  %v166_v34 = vld [vmem:[%s731_s4 + $0x8] sm:$0xff]  ;;  %vm336_vm13 = vcmask 523264  }
   0xb   :  { %v164_v38 = vld [vmem:[%s730_s3 + $0x8] sm:$0xff]  ;;  %s601_s21 = smov [#allocation3]   ;;  %vm410_vm14 = vcmask 8192  }
   0xc   :  { %s418_s22 = sshll.u32 %s601_s21, 4  ;;  %s419_s22 = int_to_ptr.vmem [resolvable:$true] %s418_s22 }
   0xd   :  { %s564_s23 = scalar_lea.vmem %s419_s22, 16  ;;  %s568_s24 = scalar_lea.vmem %s419_s22, 32 }
   0xe   :  { %p565_p0 = scmp.ne.s32.totalorder %s419_s22, %s564_s23  ;;  %p569_p1 = scmp.lt.s32.totalorder %s419_s22, %s419_s22 }
   0xf   :  { %p570_p2 = scmp.lt.s32.totalorder %s568_s24, %s564_s23 }
  0x11   :  { %p571_p3 = por %p570_p2, %p569_p1 }
  0x13   :  { %p572_p4 = pnand %p571_p3, %p565_p0 }
  0x76   :  { %v34_v6 = vpop.permute.xlu0 %33 }
  0x77   :  { %v492_v8 = vpack.c.bf16 %v29_v1, %v34_v6 }
  0x79   :  { %494 = vmatpush3.bf16.msk.msra.mxu1 %vm656_vm4, %v492_v8  ;;  %v326_v8 = vld [vmem:[#allocation2] sm:$0x1] }
  0x7a   :  { %458 = vmatprep.subr.mxu1 %v591_v4  ;;  %v39_v9 = vpop.permute.xlu0 %38 }
  0x7d   :  { %459 = vmatpush3.msk.msra.mxu1 %vm41_vm5, %v39_v9 }
  0x7e   :  { %461 = vmatmul.mubr.msk.f32.vlgmr.msra.gmra.mrb[0].mxu1 %vm48_vm6, %v30_v10 }
  0x7f   :  { %469 = vmatprep.mubr.msk.f32.mxu1 %vm48_vm6, %v163_v25 }
  0x86   :  { %v46_v11 = vpop.permute.xlu1 %45 }
 0x151   :  { %v118_v12 = vpop.f32.mrb[0].mxu1 }
 0x152   :  { %v119_v13 = vadd.f32 %v118_v12, %v46_v11  ;;  %v462_v14 = vpop.f32.mrb[1].mxu1 }
 0x154   :  { %v122_v15 = vmax.f32 %v119_v13, 0.0 }
 0x156   :  { %124 = vrot.lane.b32.xlu1 %v122_v15, %s593_s0 }
 0x1c8   :  { %v125_v16 = vpop.permute.xlu1 %124 }
 0x1c9   :  { %v127_v17 = vmax.f32 %v122_v15, %v125_v16 }
 0x1cb   :  { %132 = vrot.lane.b32.xlu1 %v127_v17, %s595_s8  ;;  %129 = vrot.lane.b32.xlu0 %v127_v17, %s593_s0 }
 0x1cf   :  { %138 = vrot.lane.b32.xlu1 %v127_v17, %s596_s9  ;;  %135 = vrot.lane.b32.xlu0 %v127_v17, %s597_s1 }
 0x1d3   :  { %144 = vrot.lane.b32.xlu1 %v127_v17, %s598_s10  ;;  %141 = vrot.lane.b32.xlu0 %v127_v17, %s599_s11 }
 0x1d7   :  { %147 = vrot.lane.b32.xlu0 %v127_v17, %s600_s12 }
 0x23d   :  { %v133_v18 = vpop.permute.xlu1 %132  ;;  %v130_v19 = vpop.permute.xlu0 %129 }
 0x23e   :  { %v150_v20 = vsel %vm36_vm1, %v127_v17, %v130_v19 }
 0x23f   :  { %v152_v22 = vsel %vm151_vm7, %v150_v20, %v133_v18 }
 0x241   :  { %v139_v21 = vpop.permute.xlu1 %138  ;;  %v136_v23 = vpop.permute.xlu0 %135 }
 0x242   :  { %v154_v24 = vsel %vm153_vm8, %v152_v22, %v136_v23  ;;  %v332_v22 = vlaneseq }
 0x243   :  { %v156_v26 = vsel %vm155_vm9, %v154_v24, %v139_v21  ;;  %v325_v21 = vld [vmem:[%s732_s5] sm:$0x1] }
 0x244   :  { %v333_v23 = vshrl.u32 %v332_v22, 7 }
 0x245   :  { %v142_v27 = vpop.permute.xlu0 %141  ;;  %v145_v28 = vpop.permute.xlu1 %144 }
 0x246   :  { %v158_v29 = vsel %vm157_vm10, %v156_v26, %v142_v27  ;;  %v334_v24 = vsub.s32 0, %v333_v23 }
 0x247   :  { %v160_v31 = vsel %vm159_vm11, %v158_v29, %v145_v28 }
 0x249   :  { %v148_v30 = vpop.permute.xlu0 %147 }
 0x24a   :  { %v162_v32 = vsel %vm161_vm12, %v160_v31, %v148_v30 }
 0x24b   :  { %172 = vrot.lane.b32.xlu0 %v162_v32, %s593_s0  ;;  %168 = vrot.lane.b32.xlu1 %v162_v32, %s588_s28 }
 0x24f   :  { %178 = vperm.xlu1 %527, %v165_v33   ;;  %183 = vperm.xlu0 %528, %v166_v34  }
 0x2bd   :  { %v169_v35 = vpop.permute.xlu1 %168  ;;  %v173_v37 = vpop.permute.xlu0 %172 }
 0x2be   :  { %v495_v36 = vpack.c.bf16 %v162_v32, %v169_v35 }
 0x2c0   :  { %497 = vmatprep.subr.msk.bf16.mxu1 %vm656_vm4, %v495_v36 }
 0x2c1   :  { %500 = vmatpush3.bf16.msk.msra.mxu1 %vm656_vm4, %v495_v36 }
 0x2c2   :  { %467 = vmatprep.subr.msk.mxu1 %vm161_vm12, %v173_v37 }
 0x2c5   :  { %468 = vmatpush3.msk.msra.mxu1 %vm161_vm12, %v173_v37 }
 0x2c6   :  { %470 = vmatmul.mubr.msk.f32.vlgmr.msra.gmra.mrb[2].mxu1 %vm48_vm6, %v164_v38 }
 0x2ce   :  { %v184_v39 = vpop.permute.xlu0 %183  ;;  %v179_v41 = vpop.permute.xlu1 %178 }
 0x399   :  { %v471_v40 = vpop.f32.mrb[2].mxu1 }
 0x39a   :  { %v264_v42 = vadd.f32 %v471_v40, %v184_v39  ;;  %v258_v43 = vpop.f32.mrb[3].mxu1 }
 0x39b   :  { %v259_v44 = vadd.f32 %v258_v43, %v179_v41 }
 0x39c   :  { %v268_v45 = vmax.f32 %v264_v42, 0.0 }
 0x39d   :  { %v267_v46 = vmax.f32 %v259_v44, 0.0 }
 0x39f   :  { %v529_v47 = vpack.i.bf16 %v268_v45, %v267_v46 }
 0x3a1   :  { %530 = vrot.lane.b32.xlu1 %v529_v47, %s593_s0 }
 0x413   :  { %v531_v48 = vpop.permute.xlu1 %530 }
 0x414   :  { %v533_v49 = vunpack.i.h.bf16 %v531_v48  ;;  %v532_v50 = vunpack.i.l.bf16 %v531_v48 }
 0x416   :  { %v278_v51 = vmax.f32 %v268_v45, %v533_v49  ;;  %v277_v52 = vmax.f32 %v267_v46, %v532_v50 }
 0x418   :  { %v539_v53 = vpack.i.bf16 %v278_v51, %v277_v52 }
 0x41a   :  { %540 = vrot.lane.b32.xlu0 %v539_v53, %s595_s8  ;;  %535 = vrot.lane.b32.xlu1 %v539_v53, %s593_s0 }
 0x41e   :  { %545 = vrot.lane.b32.xlu1 %v539_v53, %s597_s1 }
 0x48c   :  { %v541_v54 = vpop.permute.xlu0 %540  ;;  %v536_v55 = vpop.permute.xlu1 %535 }
 0x48d   :  { %v538_v56 = vunpack.i.h.bf16 %v536_v55  ;;  %v537_v57 = vunpack.i.l.bf16 %v536_v55  ;;  %v543_v58 = vunpack.i.h.bf16 %v541_v54  ;;  %v542_v59 = vunpack.i.l.bf16 %v541_v54 }
 0x48f   :  { %v300_v60 = vsel %vm36_vm1, %v278_v51, %v538_v56  ;;  %v299_v61 = vsel %vm36_vm1, %v277_v52, %v537_v57 }
 0x490   :  { %v546_v62 = vpop.permute.xlu1 %545  ;;  %v301_v1 = vsel %vm151_vm7, %v299_v61, %v542_v59  ;;  %v302_v3 = vsel %vm151_vm7, %v300_v60, %v543_v58 }
 0x491   :  { %v548_v63 = vunpack.i.h.bf16 %v546_v62  ;;  %v547_v0 = vunpack.i.l.bf16 %v546_v62 }
 0x493   :  { %v303_v4 = vsel %vm153_vm8, %v301_v1, %v547_v0  ;;  %v304_v5 = vsel %vm153_vm8, %v302_v3, %v548_v63 }
 0x494   :  { %v554_v6 = vpack.i.bf16 %v304_v5, %v303_v4  ;;  %v502_v7 = vpack.c.bf16 %v304_v5, %v303_v4 }
 0x496   :  { %555 = vrot.lane.b32.xlu1 %v554_v6, %s595_s8  ;;  %550 = vrot.lane.b32.xlu0 %v554_v6, %s593_s0 }
 0x497   :  { %503 = vmatpush3.bf16.msra.mxu0 %v502_v7 }
 0x498   :  { %504 = vmatprep.subr.bf16.mxu0 %v589_v2 }
 0x49a   :  { %329 = vperm.xlu1 %527, %v326_v8   ;;  %560 = vrot.lane.b32.xlu0 %v554_v6, %s597_s1 }
 0x508   :  { %v556_v9 = vpop.permute.xlu1 %555  ;;  %v551_v10 = vpop.permute.xlu0 %550 }
 0x509   :  { %v553_v11 = vunpack.i.h.bf16 %v551_v10  ;;  %v552_v12 = vunpack.i.l.bf16 %v551_v10  ;;  %v558_v13 = vunpack.i.h.bf16 %v556_v9  ;;  %v557_v14 = vunpack.i.l.bf16 %v556_v9 }
 0x50b   :  { %v505_v15 = vpack.c.bf16 %v553_v11, %v552_v12  ;;  %v508_v17 = vpack.c.bf16 %v558_v13, %v557_v14 }
 0x50c   :  { %v561_v16 = vpop.permute.xlu0 %560 }
 0x50d   :  { %506 = vmatpush3.bf16.msra.mxu0 %v505_v15  ;;  %v563_v18 = vunpack.i.h.bf16 %v561_v16  ;;  %v562_v19 = vunpack.i.l.bf16 %v561_v16 }
 0x50e   :  { %507 = vmatprep.subr.bf16.mxu0 %v589_v2 }
 0x50f   :  { %v511_v20 = vpack.c.bf16 %v563_v18, %v562_v19 }
 0x511   :  { %509 = vmatpush3.bf16.msra.mxu0 %v508_v17 }
 0x512   :  { %510 = vmatprep.subr.bf16.mxu0 %v589_v2 }
 0x515   :  { %512 = vmatpush3.bf16.msra.mxu0 %v511_v20 }
 0x518   :  { %489 = vmatmul.mubr.msk.f32.vlgmr.msra.gmra.mrb[0].mxu0 %vm336_vm13, %v325_v21 }
 0x519   :  { %v330_v25 = vpop.permute.xlu1 %329 }
 0x51a   :  { %v335_v26 = vrot.slane %v330_v25, %v334_v24 }
 0x5eb   :  { %v406_v27 = vpop.f32.mrb[0].mxu0 }
 0x5ec   :  { %v407_v28 = vadd.f32 %v406_v27, %v335_v26  ;;  %v490_v29 = vpop.f32.mrb[1].mxu0 }
 0x5ee   :  { %411 = vst.msk [vmem:[#allocation3] sm:$0x1] %vm410_vm14, %v407_v28 }
 0x5ef   :  { %575 = shalt.err (!%p572_p4)
}
 0x5f0   :  { %s576_s26 = scalar_lea.hbm %s734_s7, 16 }
 0x5f1   :  { %p577_p5 = scmp.ne.s32.totalorder %s734_s7, %s576_s26  ;;  %p580_p6 = scmp.lt.u32.totalorder %s576_s26, %s734_s7 }
 0x5f3   :  { %p582_p7 = pnand %p580_p6, %p577_p5 }
 0x5f5   :  { %585 = shalt.err (!%p582_p7)
}
 0x5f6   :  { %421 = dma.vmem_to_hbm [thread:$0]  %s419_s22, 16, %s734_s7, [#allocation4]  }
 0x5f7   :  { %586 = dma.done.wait [#allocation4], 16  }
 0x5f8   :  { %587 = vsyncadd [#allocation4], 4294967280 }
 0x5f9   :  { %425 = vsyncpa [#allocation4], 1 }

</bundles_post_ra>
